<compile_context>
chip_gen: v7x
topology: tpu7x:2x2x1
jax: 0.10.0
libtpu: 0.0.40
codegen_flags: <defaults>
</compile_context>

<pallas_src>
import functools
import math

import jax
import jax.numpy as jnp
from jax.experimental import pallas as pl
from jax.experimental.pallas import tpu as pltpu

LN_EPS = 1e-5


def _gelu(x, approximate):
    if approximate:
        # tanh form lowers to the EUP (its own VLIW slot on v6e/v7x).
        return jax.nn.gelu(x, approximate=True)
    # PyTorch nn.GELU() default: exact erf-based GELU.
    return 0.5 * x * (1.0 + jax.lax.erf(x * (1.0 / math.sqrt(2.0))))


def _token_mixing_kernel(x_ref, gamma_ref, beta_ref, w1_ref, b1_ref,
                         w2_ref, b2_ref, o_ref, *, c_real, compute_dtype,
                         approximate_gelu):
    tb, s_pad, c_pad = x_ref.shape

    # Channel mask for LayerNorm when C was padded up to a lane multiple.
    if c_pad != c_real:
        lane = jax.lax.broadcasted_iota(jnp.int32, (s_pad, c_pad), 1)
        ch_mask = lane < c_real
    else:
        ch_mask = None

    gamma = gamma_ref[...]            # (1, C_pad)  f32 (padded with zeros)
    beta = beta_ref[...]              # (1, C_pad)  f32 (padded with zeros)
    w1 = w1_ref[...]                  # (H, S_pad)  compute_dtype (PyTorch layout)
    w2 = w2_ref[...]                  # (S_pad, H)  compute_dtype (PyTorch layout)
    b1 = b1_ref[...]                  # (H, 1)      f32
    b2 = b2_ref[...]                  # (S_pad, 1)  f32

    inv_c = 1.0 / c_real

    # tb is a small static block; unrolled loop keeps two MXU matmuls per
    # batch element with no transposes anywhere.
    for b in range(tb):
        x = x_ref[b].astype(jnp.float32)                # (S_pad, C_pad)

        # ---- LayerNorm over channels (masked to the real C) ----
        mean = jnp.sum(x, axis=-1, keepdims=True) * inv_c
        xc = x - mean
        if ch_mask is not None:
            xc = jnp.where(ch_mask, xc, 0.0)
        var = jnp.sum(xc * xc, axis=-1, keepdims=True) * inv_c
        inv = jax.lax.rsqrt(var + LN_EPS)
        h = xc * inv * gamma + beta                     # (S_pad, C_pad), f32
        # Padded channel columns of h are exactly 0 (gamma/beta padded with 0).

        # ---- Token-mixing MLP, transpose-free (contract over tokens) ----
        z = jnp.dot(w1, h.astype(compute_dtype),
                    preferred_element_type=jnp.float32)  # (H, C_pad)
        z = _gelu(z + b1, approximate_gelu)
        y = jnp.dot(w2, z.astype(compute_dtype),
                    preferred_element_type=jnp.float32)  # (S_pad, C_pad)
        y = y + b2

        # ---- residual ----
        o_ref[b] = (y + x).astype(o_ref.dtype)


def _round_up(n, m):
    return ((n + m - 1) // m) * m


def _pick_block_b(batch, max_block):
    # Prefer >= 2 grid steps (so v7x's two TensorCores both get work) while
    # packing several batch elements per step to amortize pipeline overhead.
    for tb in range(min(batch, max_block), 0, -1):
        if batch % tb == 0 and batch // tb >= 2:
            return tb
    return batch


def token_mixing_mlp(x, gamma, beta, w1_pt, b1, w2_pt, b2, *,
                     compute_dtype=jnp.bfloat16, approximate_gelu=False,
                     max_block_b=8):
    """MLP-Mixer token-mixing block.

    x:     (B, S, C) activations.
    gamma, beta: (C,) LayerNorm affine parameters.
    w1_pt: (H, S)  PyTorch nn.Linear(S, H).weight  (NOT transposed).
    b1:    (H,)
    w2_pt: (S, H)  PyTorch nn.Linear(H, S).weight  (NOT transposed).
    b2:    (S,)
    """
    B, S, C = x.shape
    H = w1_pt.shape[0]
    assert w1_pt.shape == (H, S) and w2_pt.shape == (S, H)
    assert b1.shape == (H,) and b2.shape == (S,)

    # Lane/sublane-friendly padding (lane dim multiple of 128, sublane of 8).
    S_pad = _round_up(S, 8)
    C_pad = _round_up(C, 128)

    x_p = x
    if (S_pad, C_pad) != (S, C):
        x_p = jnp.pad(x, ((0, 0), (0, S_pad - S), (0, C_pad - C)))
    gamma_p = jnp.pad(gamma.astype(jnp.float32), (0, C_pad - C)).reshape(1, C_pad)
    beta_p = jnp.pad(beta.astype(jnp.float32), (0, C_pad - C)).reshape(1, C_pad)
    w1_p = jnp.pad(w1_pt, ((0, 0), (0, S_pad - S))).astype(compute_dtype)
    w2_p = jnp.pad(w2_pt, ((0, S_pad - S), (0, 0))).astype(compute_dtype)
    b1_p = b1.astype(jnp.float32).reshape(H, 1)
    b2_p = jnp.pad(b2.astype(jnp.float32), (0, S_pad - S)).reshape(S_pad, 1)

    TB = _pick_block_b(B, max_block_b)
    grid = (B // TB,)

    # VMEM budget: double-buffered x/out tiles + (double-buffered) params.
    act_itemsize = jnp.dtype(x.dtype).itemsize
    w_itemsize = jnp.dtype(compute_dtype).itemsize
    tile_bytes = TB * S_pad * C_pad * act_itemsize
    param_bytes = (2 * H * S_pad) * w_itemsize + (2 * C_pad + H + S_pad) * 4
    needed = 2 * (2 * tile_bytes) + 2 * param_bytes
    vmem_limit = int(min(max(2 * needed, 32 * 1024 * 1024), 64 * 1024 * 1024))

    cost = pl.CostEstimate(
        flops=int(4 * B * H * S_pad * C_pad),
        transcendentals=int(B * H * C_pad),
        bytes_accessed=int(2 * B * S_pad * C_pad * act_itemsize
                           + 2 * H * S_pad * w_itemsize
                           + (2 * C_pad + H + S_pad) * 4),
    )

    kernel = functools.partial(
        _token_mixing_kernel,
        c_real=C,
        compute_dtype=compute_dtype,
        approximate_gelu=approximate_gelu,
    )

    out_p = pl.pallas_call(
        kernel,
        out_shape=jax.ShapeDtypeStruct((B, S_pad, C_pad), x.dtype),
        grid_spec=pltpu.PrefetchScalarGridSpec(
            num_scalar_prefetch=0,
            grid=grid,
            in_specs=[
                pl.BlockSpec((TB, S_pad, C_pad), lambda b: (b, 0, 0)),  # x
                pl.BlockSpec((1, C_pad), lambda b: (0, 0)),             # gamma
                pl.BlockSpec((1, C_pad), lambda b: (0, 0)),             # beta
                pl.BlockSpec((H, S_pad), lambda b: (0, 0)),             # W1 (H,S)
                pl.BlockSpec((H, 1), lambda b: (0, 0)),                 # b1
                pl.BlockSpec((S_pad, H), lambda b: (0, 0)),             # W2 (S,H)
                pl.BlockSpec((S_pad, 1), lambda b: (0, 0)),             # b2
            ],
            out_specs=pl.BlockSpec((TB, S_pad, C_pad), lambda b: (b, 0, 0)),
        ),
        compiler_params=pltpu.CompilerParams(
            dimension_semantics=("parallel",),
            vmem_limit_bytes=vmem_limit),
        cost_estimate=cost,
    )(x_p, gamma_p, beta_p, w1_p, b1_p, w2_p, b2_p)

    if (S_pad, C_pad) != (S, C):
        out_p = out_p[:, :S, :C]
    return out_p


def reference_forward(x, gamma, beta, w1_pt, b1, w2_pt, b2):
    """Plain-JAX reference mirroring the PyTorch module exactly."""
    mean = jnp.mean(x, axis=-1, keepdims=True)
    var = jnp.mean(jnp.square(x - mean), axis=-1, keepdims=True)
    h = (x - mean) / jnp.sqrt(var + LN_EPS) * gamma + beta
    ht = jnp.swapaxes(h, 1, 2)                      # (B, C, S)
    z = _gelu(ht @ w1_pt.T + b1, False)             # (B, C, H)
    y = z @ w2_pt.T + b2                            # (B, C, S)
    return jnp.swapaxes(y, 1, 2) + x


if __name__ == "__main__":
    # Small shapes: batch=2, num_tokens(S)=8, num_channels(C)=4, hidden=32.
    B, S, C, H = 2, 8, 4, 32
    key = jax.random.PRNGKey(0)
    kx, kg, kb, k1, k1b, k2, k2b = jax.random.split(key, 7)

    x = jax.random.normal(kx, (B, S, C), dtype=jnp.float32)

    gamma = 1.0 + 0.1 * jax.random.normal(kg, (C,), jnp.float32)
    beta = 0.1 * jax.random.normal(kb, (C,), jnp.float32)
    # nn.Linear(S, H): weight (H, S), bias (H)
    bound1 = 1.0 / math.sqrt(S)
    w1_pt = jax.random.uniform(k1, (H, S), jnp.float32, -bound1, bound1)
    b1 = jax.random.uniform(k1b, (H,), jnp.float32, -bound1, bound1)
    # nn.Linear(H, S): weight (S, H), bias (S)
    bound2 = 1.0 / math.sqrt(H)
    w2_pt = jax.random.uniform(k2, (S, H), jnp.float32, -bound2, bound2)
    b2 = jax.random.uniform(k2b, (S,), jnp.float32, -bound2, bound2)

    ref = reference_forward(x, gamma, beta, w1_pt, b1, w2_pt, b2)

    # 1) Exact-parity check: f32 matmul operands, tight tolerance.
    out_f32 = token_mixing_mlp(x, gamma, beta, w1_pt, b1, w2_pt, b2,
                               compute_dtype=jnp.float32)
    out_f32 = jax.block_until_ready(out_f32)
    assert out_f32.shape == (B, S, C)
    assert jnp.allclose(out_f32, ref, atol=1e-4, rtol=1e-4), "f32 mismatch vs reference"

    # 2) Default fast path: bf16 matmul operands, f32 accumulation.
    out_bf16 = token_mixing_mlp(x, gamma, beta, w1_pt, b1, w2_pt, b2)
    out_bf16 = jax.block_until_ready(out_bf16)
    assert out_bf16.shape == (B, S, C)
    assert jnp.allclose(out_bf16, ref, atol=5e-2, rtol=5e-2), "bf16 mismatch vs reference"

    print("KERNEL_OK")
</pallas_src>

<mosaic_0001>
module attributes {stable_mosaic.version = 11 : i64} {
  func.func @_token_mixing_kernel(%arg0: i32, %arg1: memref<1x8x128xf32, #tpu.memory_space<vmem>>, %arg2: memref<1x128xf32, #tpu.memory_space<vmem>>, %arg3: memref<1x128xf32, #tpu.memory_space<vmem>>, %arg4: memref<32x8xf32, #tpu.memory_space<vmem>>, %arg5: memref<32x1xf32, #tpu.memory_space<vmem>>, %arg6: memref<8x32xf32, #tpu.memory_space<vmem>>, %arg7: memref<8x1xf32, #tpu.memory_space<vmem>>, %arg8: memref<1x8x128xf32, #tpu.memory_space<vmem>>) attributes {dimension_semantics = [#tpu.dimension_semantics<parallel>], iteration_bounds = array<i64: 2>, scalar_prefetch = 0 : i64, scratch_operands = 0 : i64, tpu.core_type = #tpu.core_type<tc>, window_params = [{transform_indices = @transform_0, window_bounds = array<i64: 1, 8, 128>}, {pipeline_mode = #tpu.pipeline_mode<synchronous>, transform_indices = @transform_1, window_bounds = array<i64: 1, 128>}, {pipeline_mode = #tpu.pipeline_mode<synchronous>, transform_indices = @transform_2, window_bounds = array<i64: 1, 128>}, {pipeline_mode = #tpu.pipeline_mode<synchronous>, transform_indices = @transform_3, window_bounds = array<i64: 32, 8>}, {pipeline_mode = #tpu.pipeline_mode<synchronous>, transform_indices = @transform_4, window_bounds = array<i64: 32, 1>}, {pipeline_mode = #tpu.pipeline_mode<synchronous>, transform_indices = @transform_5, window_bounds = array<i64: 8, 32>}, {pipeline_mode = #tpu.pipeline_mode<synchronous>, transform_indices = @transform_6, window_bounds = array<i64: 8, 1>}, {transform_indices = @transform_7, window_bounds = array<i64: 1, 8, 128>}]} {
    %0 = tpu.iota {dimensions = array<i32: 1>} : vector<8x128xi32>
    %c4_i32 = arith.constant 4 : i32
    %1 = vector.broadcast %c4_i32 : i32 to vector<8x128xi32>
    %2 = arith.cmpi slt, %0, %1 : vector<8x128xi32>
    %c0 = arith.constant 0 : index
    %c0_0 = arith.constant 0 : index
    %3 = vector.load %arg2[%c0, %c0_0] : memref<1x128xf32, #tpu.memory_space<vmem>>, vector<1x128xf32>
    %c0_1 = arith.constant 0 : index
    %c0_2 = arith.constant 0 : index
    %4 = vector.load %arg3[%c0_1, %c0_2] : memref<1x128xf32, #tpu.memory_space<vmem>>, vector<1x128xf32>
    %c0_3 = arith.constant 0 : index
    %c0_4 = arith.constant 0 : index
    %5 = vector.load %arg4[%c0_3, %c0_4] : memref<32x8xf32, #tpu.memory_space<vmem>>, vector<32x8xf32>
    %c0_5 = arith.constant 0 : index
    %c0_6 = arith.constant 0 : index
    %6 = vector.load %arg6[%c0_5, %c0_6] : memref<8x32xf32, #tpu.memory_space<vmem>>, vector<8x32xf32>
    %c0_7 = arith.constant 0 : index
    %c0_8 = arith.constant 0 : index
    %7 = vector.load %arg5[%c0_7, %c0_8] : memref<32x1xf32, #tpu.memory_space<vmem>>, vector<32x1xf32>
    %c0_9 = arith.constant 0 : index
    %c0_10 = arith.constant 0 : index
    %8 = vector.load %arg7[%c0_9, %c0_10] : memref<8x1xf32, #tpu.memory_space<vmem>>, vector<8x1xf32>
    %c0_11 = arith.constant 0 : index
    %c0_12 = arith.constant 0 : index
    %c0_13 = arith.constant 0 : index
    %9 = vector.load %arg1[%c0_11, %c0_12, %c0_13] : memref<1x8x128xf32, #tpu.memory_space<vmem>>, vector<1x8x128xf32>
    %10 = vector.shape_cast %9 : vector<1x8x128xf32> to vector<8x128xf32>
    %cst = arith.constant dense<0.000000e+00> : vector<8xf32>
    %11 = vector.multi_reduction <add>, %10, %cst [1] : vector<8x128xf32> to vector<8xf32>
    %12 = vector.shape_cast %11 : vector<8xf32> to vector<8x1xf32>
    %cst_14 = arith.constant 2.500000e-01 : f32
    %13 = vector.broadcast %cst_14 : f32 to vector<8x1xf32>
    %14 = arith.mulf %12, %13 : vector<8x1xf32>
    %15 = vector.broadcast %14 : vector<8x1xf32> to vector<8x128xf32>
    %16 = arith.subf %10, %15 : vector<8x128xf32>
    %cst_15 = arith.constant 0.000000e+00 : f32
    %17 = vector.broadcast %cst_15 : f32 to vector<8x128xf32>
    %18 = arith.select %2, %16, %17 : vector<8x128xi1>, vector<8x128xf32>
    %19 = arith.mulf %18, %18 : vector<8x128xf32>
    %cst_16 = arith.constant dense<0.000000e+00> : vector<8xf32>
    %20 = vector.multi_reduction <add>, %19, %cst_16 [1] : vector<8x128xf32> to vector<8xf32>
    %21 = vector.shape_cast %20 : vector<8xf32> to vector<8x1xf32>
    %cst_17 = arith.constant 2.500000e-01 : f32
    %22 = vector.broadcast %cst_17 : f32 to vector<8x1xf32>
    %23 = arith.mulf %21, %22 : vector<8x1xf32>
    %cst_18 = arith.constant 9.99999974E-6 : f32
    %24 = vector.broadcast %cst_18 : f32 to vector<8x1xf32>
    %25 = arith.addf %23, %24 : vector<8x1xf32>
    %26 = math.rsqrt %25 : vector<8x1xf32>
    %27 = vector.broadcast %26 : vector<8x1xf32> to vector<8x128xf32>
    %28 = arith.mulf %18, %27 : vector<8x128xf32>
    %29 = vector.broadcast %3 : vector<1x128xf32> to vector<8x128xf32>
    %30 = arith.mulf %28, %29 : vector<8x128xf32>
    %31 = vector.broadcast %4 : vector<1x128xf32> to vector<8x128xf32>
    %32 = arith.addf %30, %31 : vector<8x128xf32>
    %cst_19 = arith.constant dense<0.000000e+00> : vector<32x128xf32>
    %33 = tpu.matmul %5, %32, %cst_19 {dimension_numbers = #tpu.dot_dimension_numbers<[1], [0], [0], [1], [0, 0, 1, 1], [], []>} : vector<32x8xf32>, vector<8x128xf32>, vector<32x128xf32> -> vector<32x128xf32>
    %34 = vector.broadcast %7 : vector<32x1xf32> to vector<32x128xf32>
    %35 = arith.addf %33, %34 : vector<32x128xf32>
    %cst_20 = arith.constant 5.000000e-01 : f32
    %36 = vector.broadcast %cst_20 : f32 to vector<32x128xf32>
    %37 = arith.mulf %36, %35 : vector<32x128xf32>
    %cst_21 = arith.constant 0.707106769 : f32
    %38 = vector.broadcast %cst_21 : f32 to vector<32x128xf32>
    %39 = arith.mulf %35, %38 : vector<32x128xf32>
    %40 = math.erf %39 : vector<32x128xf32>
    %cst_22 = arith.constant 1.000000e+00 : f32
    %41 = vector.broadcast %cst_22 : f32 to vector<32x128xf32>
    %42 = arith.addf %41, %40 : vector<32x128xf32>
    %43 = arith.mulf %37, %42 : vector<32x128xf32>
    %cst_23 = arith.constant dense<0.000000e+00> : vector<8x128xf32>
    %44 = tpu.matmul %6, %43, %cst_23 {dimension_numbers = #tpu.dot_dimension_numbers<[1], [0], [0], [1], [0, 0, 1, 1], [], []>} : vector<8x32xf32>, vector<32x128xf32>, vector<8x128xf32> -> vector<8x128xf32>
    %45 = vector.broadcast %8 : vector<8x1xf32> to vector<8x128xf32>
    %46 = arith.addf %44, %45 : vector<8x128xf32>
    %47 = arith.addf %46, %10 : vector<8x128xf32>
    %c0_24 = arith.constant 0 : index
    %c0_25 = arith.constant 0 : index
    %c0_26 = arith.constant 0 : index
    %48 = vector.load %arg8[%c0_24, %c0_25, %c0_26] : memref<1x8x128xf32, #tpu.memory_space<vmem>>, vector<1x8x128xf32>
    %49 = vector.shape_cast %48 : vector<1x8x128xf32> to vector<8x128xf32>
    %50 = vector.shape_cast %47 : vector<8x128xf32> to vector<1x8x128xf32>
    tpu.vector_store %arg8[%c0_24, %c0_25, %c0_26], %50 {strides = array<i32>} : memref<1x8x128xf32, #tpu.memory_space<vmem>>, vector<1x8x128xf32>,
    return
  }
  func.func @transform_0(%arg0: i32) -> (i32, i32, i32) {
    %c0_i32 = arith.constant 0 : i32
    %c0_i32_0 = arith.constant 0 : i32
    %c0_i32_1 = arith.constant 0 : i32
    return %arg0, %c0_i32, %c0_i32_0 : i32, i32, i32
  }
  func.func @transform_1(%arg0: i32) -> (i32, i32) {
    %c0_i32 = arith.constant 0 : i32
    %c0_i32_0 = arith.constant 0 : i32
    %c0_i32_1 = arith.constant 0 : i32
    return %c0_i32, %c0_i32_0 : i32, i32
  }
  func.func @transform_2(%arg0: i32) -> (i32, i32) {
    %c0_i32 = arith.constant 0 : i32
    %c0_i32_0 = arith.constant 0 : i32
    %c0_i32_1 = arith.constant 0 : i32
    return %c0_i32, %c0_i32_0 : i32, i32
  }
  func.func @transform_3(%arg0: i32) -> (i32, i32) {
    %c0_i32 = arith.constant 0 : i32
    %c0_i32_0 = arith.constant 0 : i32
    %c0_i32_1 = arith.constant 0 : i32
    return %c0_i32, %c0_i32_0 : i32, i32
  }
  func.func @transform_4(%arg0: i32) -> (i32, i32) {
    %c0_i32 = arith.constant 0 : i32
    %c0_i32_0 = arith.constant 0 : i32
    %c0_i32_1 = arith.constant 0 : i32
    return %c0_i32, %c0_i32_0 : i32, i32
  }
  func.func @transform_5(%arg0: i32) -> (i32, i32) {
    %c0_i32 = arith.constant 0 : i32
    %c0_i32_0 = arith.constant 0 : i32
    %c0_i32_1 = arith.constant 0 : i32
    return %c0_i32, %c0_i32_0 : i32, i32
  }
  func.func @transform_6(%arg0: i32) -> (i32, i32) {
    %c0_i32 = arith.constant 0 : i32
    %c0_i32_0 = arith.constant 0 : i32
    %c0_i32_1 = arith.constant 0 : i32
    return %c0_i32, %c0_i32_0 : i32, i32
  }
  func.func @transform_7(%arg0: i32) -> (i32, i32, i32) {
    %c0_i32 = arith.constant 0 : i32
    %c0_i32_0 = arith.constant 0 : i32
    %c0_i32_1 = arith.constant 0 : i32
    return %arg0, %c0_i32, %c0_i32_0 : i32, i32, i32
  }
}

</mosaic_0001>

<bundles_post_ra>
// kernel: tpu_custom_call.1
= control target key start
LH: loop header
LB: loop body
LE: loop exit
PB: predicated region body
PF: predicated region fallthrough
CT: control target
= control target key end

     0   :  { %12 = vsyncpa [#allocation3], 0  ;;  %s969_s0 = inlined_call_operand.vmem [shape: f32[2,8,128], index: 0, kind: input, shape index: {}]   ;;  %s970_s1 = inlined_call_operand.vmem [shape: f32[1,128], index: 1, kind: input, shape index: {}]   ;;  %s971_s2 = inlined_call_operand.vmem [shape: f32[1,128], index: 2, kind: input, shape index: {}]   ;;  %s972_s3 = inlined_call_operand.vmem [shape: f32[32,8], index: 3, kind: input, shape index: {}]   ;;  %s973_s4 = inlined_call_operand.vmem [shape: f32[32,1], index: 4, kind: input, shape index: {}]   ;;  %s974_s5 = inlined_call_operand.vmem [shape: f32[8,32], index: 5, kind: input, shape index: {}]   ;;  %s975_s6 = inlined_call_operand.vmem [shape: f32[8,1], index: 6, kind: input, shape index: {}]   ;;  %s976_s7 = inlined_call_operand.hbm [shape: f32[2,8,128], index: 7, kind: output, shape index: {}]  }
   0x1   :  { %14 = vsyncpa [#allocation3 + $0x1], 0  ;;  %s824_s24 = smov 0   ;;  %s826_s25 = smov 0  }
   0x2   :  { %s828_s26 = smov 0   ;;  %s830_s27 = smov 0  }
   0x3 LB: > { %s845_s28 = sadd.s32 4294967295, %s777_s27   ;;  %s608_s29 = sadd.s32 4294967294, %s777_s27   ;;  %s777_s27 = sphi %s830_s27, %s982_s27   ;;  %s773_s26 = sphi %s828_s26, %s981_s26   ;;  %s769_s25 = sphi %s826_s25, %s980_s25   ;;  %s765_s24 = sphi %s824_s24, %s979_s24  }
   0x4   : > { %s849_s30 = sadd.s32 1, %s777_s27   ;;  %s179_s8 = sadd.s32 1, %s773_s26 }
   0x5   : > { %s176_s9 = ssub.s32 %s777_s27, %s849_s30  ;;  %p189_p0 = scmp.ne.s32.totalorder %s773_s26, %s769_s25 }
   0x6   : > { %p177_p1 = scmp.eq.s32.totalorder %s176_s9, 0  ;;  %p190_p2 = scmp.eq.s32.totalorder %s845_s28, 1 }
   0x7   : > { %p195_p3 = scmp.ne.s32.totalorder %s769_s25, %s765_s24  ;;  %p196_p4 = scmp.eq.s32.totalorder %s608_s29, 1 }
   0x8   : > { %s860_s10 = scalar_select %p177_p1, %s773_s26, %s179_s8  }
   0x9   : > { %p862_p5 = por %p190_p2, %p189_p0  ;;  %p866_p6 = por %p196_p4, %p195_p3 }
   0xa   : > { %p611_p7 = scmp.ge.s32.totalorder %s777_s27, 1  ;;  %p239_p8 = scmp.lt.s32.totalorder %s777_s27, 3 }
   0xc   : > { %p240_p9 = pnand %p611_p7, %p239_p8 }
   0xd   : > { %p270_p10 = scmp.lt.s32.totalorder (!%p240_p9), %s845_s28, 1  ;;  %v274_v1 = vlaneseq (!%p240_p9)  ;;  %v279_v8 = vld [vmem:[%s972_s3] sm:$0xff] (!%p240_p9)  ;;  %vm336_vm1 = vcmask (!%p240_p9), 64512   ;;  %v779_v10 = vmov (!%p240_p9), 0   ;;  %v286_v11 = vld [vmem:[%s973_s4 + $0x10] sm:$0xff] (!%p240_p9)  ;;  %v285_v12 = vld [vmem:[%s973_s4 + $0x8] sm:$0xff] (!%p240_p9) }
   0xe   : > { %243 = sbr.rel (%p240_p9) target bundleno = 811 (0x32b), region = 48  ;;  %637 = vmatprep.mubr.msk.f32.mxu0 (!%p240_p9), %vm336_vm1, %v279_v8  ;;  %v284_v9 = vld [vmem:[%s973_s4] sm:$0xff] (!%p240_p9)  ;;  %703 = vset.pattern.permute.xlu1 (!%p240_p9), %v779_v10  ;;  %v287_v13 = vld [vmem:[%s973_s4 + $0x18] sm:$0xff] (!%p240_p9)  ;;  %v280_v24 = vld [vmem:[%s972_s3 + $0x8] sm:$0xff] (!%p240_p9)  ;;  %v780_v27 = vmov (!%p240_p9), 0.0|0.0   ;;  %vm781_vm2 = vmmov (!%p240_p9), 0  }
   0xf   : > { %v275_v2 = vand.u32 (!%p240_p9), 127, %v274_v1  ;;  %704 = vset.pattern.permute.xlu0 (!%p240_p9), %v779_v10  ;;  %318 = vperm.xlu1 (!%p240_p9), %703, %v284_v9   ;;  %v288_v14 = vld [vmem:[%s975_s6] sm:$0xff] (!%p240_p9)  ;;  %v281_v25 = vld [vmem:[%s972_s3 + $0x10] sm:$0xff] (!%p240_p9)  ;;  %v282_v26 = vld [vmem:[%s972_s3 + $0x18] sm:$0xff] (!%p240_p9)  ;;  %v782_v28 = vmov (!%p240_p9), 0.0   ;;  %vm459_vm3 = vcmask (!%p240_p9), 261120  }
  0x10   : > { %v614_v19 = vld [vmem:[%s970_s1] ss:$0 sm:$0xff] (!%p240_p9)  ;;  %654 = vmatprep.subr.bf16.mxu1 (!%p240_p9), %v780_v27  ;;  %651 = vmatprep.mubr.msk.f32.mxu1 (!%p240_p9), %vm781_vm2, %v782_v28  ;;  %s622_s16 = sshll.u32 (!%p240_p9), %s845_s28, 7 }
  0x11   : > { %vm276_vm0 = vcmp.lt.s32.totalorder (!%p240_p9), %v275_v2, 4  ;;  %v615_v21 = vld [vmem:[%s971_s2] ss:$0 sm:$0xff] (!%p240_p9)  ;;  %s927_s21 = scalar_lea.hbm (!%p240_p9), %s976_s7, %s622_s16 }
  0x12   : > { %v283_v63 = vld [vmem:[%s974_s5] sm:$0xff] (!%p240_p9) }
  0x13   : > { %323 = vperm.xlu1 (!%p240_p9), %703, %v285_v12  }
  0x15   : > { %s271_s13 = scalar_select %p270_p10, %s845_s28, 1 }
  0x16   : > { %s783_s28 = smov [#allocation2]  }
  0x17   : > { %s613_s14 = sshll.u32 %s271_s13, 3  ;;  %333 = vperm.xlu1 %703, %v287_v13   ;;  %s719_s29 = sshll.u32 %s783_s28, 4  ;;  %s720_s29 = int_to_ptr.vmem [resolvable:$false] %s719_s29 }
  0x18   : > { %s273_s17 = scalar_lea.vmem %s969_s0, %s613_s14  ;;  %s267_s14 = sand.u32 1, %s769_s25  }
  0x19   : > { %v877_v0 = vld [vmem:[%s273_s17] sm:$0xff]  ;;  %s612_s15 = sshll.u32 %s267_s14, 3  ;;  %s536_s22 = scalar_lea.sflag [#allocation3], %s267_s14 }
  0x1a   : > { %290 = vadd.xlane.f32.xlu0 %v877_v0  ;;  %s269_s17 = scalar_lea.vmem [#allocation2], %s612_s15  ;;  %s721_s8 = scalar_lea.vmem %s720_s29, 256 }
  0x1b   : > { %456 = vperm.xlu1 %703, %v288_v14   ;;  %s549_s18 = sshll.u32 %s269_s17, 4  ;;  %s929_s18 = int_to_ptr.vmem [resolvable:$true] %s549_s18 }
  0x1c   : > { %s715_s23 = scalar_lea.vmem %s929_s18, 128  ;;  %p722_p0 = scmp.lt.s32.totalorder %s929_s18, %s720_s29 }
  0x1d   : > { %p716_p11 = scmp.ne.s32.totalorder %s929_s18, %s715_s23  ;;  %p723_p1 = scmp.lt.s32.totalorder %s721_s8, %s715_s23 }
  0x1f   : > { %p717_p12 = pnand %p716_p11, %p862_p5  ;;  %p724_p2 = por %p723_p1, %p722_p0 }
  0x21   : > { %p718_p13 = pneg %p717_p12 }
  0x23   : > { %p725_p3 = pnand %p724_p2, %p718_p13 }
  0x8e   : > { %v319_v29 = vpop.permute.xlu1 %318 }
  0x92   : > { %v324_v30 = vpop.permute.xlu1 %323 }
  0x96   : > { %v334_v37 = vpop.permute.xlu1 %333 }
  0x9a   : > { %v457_v1 = vpop.permute.xlu1 %456 }
  0xa7   : > { %v291_v3 = vpop.xlane.xlu0 %290 }
  0xa8   : > { %v292_v4 = vmul.f32 0.25, %v291_v3 }
  0xaa   : > { %v293_v5 = vsub.f32 %v877_v0, %v292_v4 }
  0xac   : > { %v294_v6 = vsel %vm276_vm0, %v293_v5, 0.0 }
  0xad   : > { %v295_v7 = vmul.f32 %v294_v6, %v294_v6 }
  0xaf   : > { %296 = vadd.xlane.f32.xlu0 %v295_v7 }
  0xc5   : > { %328 = vperm.xlu0 %704, %v286_v11  }
 0x13c   : > { %v297_v15 = vpop.xlane.xlu0 %296 }
 0x13d   : > { %v298_v16 = vmul.f32 0.25, %v297_v15 }
 0x13f   : > { %v299_v17 = vadd.f32 1e-05, %v298_v16 }
 0x141   : > { %705 = vrsqrt.f32 %v299_v17 }
 0x144   : > { %v329_v36 = vpop.permute.xlu0 %328 }
 0x14b   : > { %v706_v18 = vpop.eup %705 }
 0x14c   : > { %v301_v20 = vmul.f32 %v706_v18, %v294_v6 }
 0x14e   : > { %v308_v22 = vmul.f32 %v614_v19, %v301_v20 }
 0x150   : > { %v315_v23 = vadd.f32 %v615_v21, %v308_v22 }
 0x152   : > { %635 = vmatprep.subr.mxu0 %v315_v23 }
 0x153   : > { %636 = vmatpush3.msra.mxu0 %v315_v23 }
 0x154   : > { %638 = vmatmul.mubr.msk.f32.vlgmr.msra.gmra.mrb[0].mxu0 %vm336_vm1, %v280_v24 }
 0x155   : > { %640 = vmatprep.mubr.msk.f32.mxu0 %vm336_vm1, %v281_v25 }
 0x158   : > { %641 = vmatmul.mubr.msk.f32.gmra.mrb[2].mxu0 %vm336_vm1, %v282_v26 }
 0x227   : > { %v639_v31 = vpop.f32.mrb[0].mxu0 }
 0x228   : > { %v421_v32 = vadd.f32 %v639_v31, %v324_v30  ;;  %v415_v33 = vpop.f32.mrb[1].mxu0 }
 0x229   : > { %v416_v34 = vadd.f32 %v415_v33, %v319_v29 }
 0x22a   : > { %v439_v35 = vmul.f32 0.70710677, %v421_v32  ;;  %v435_v47 = vmul.f32 0.5, %v421_v32 }
 0x22b   : > { %v438_v38 = vmul.f32 0.70710677, %v416_v34  ;;  %v642_v39 = vpop.f32.mrb[2].mxu0  ;;  %v434_v49 = vmul.f32 0.5, %v416_v34 }
 0x22c   : > { %707 = verf.f32 %v439_v35  ;;  %v431_v40 = vadd.f32 %v642_v39, %v334_v37  ;;  %v425_v41 = vpop.f32.mrb[3].mxu0 }
 0x22d   : > { %709 = verf.f32 %v438_v38  ;;  %v426_v42 = vadd.f32 %v425_v41, %v329_v36 }
 0x22e   : > { %v441_v43 = vmul.f32 0.70710677, %v431_v40  ;;  %v437_v55 = vmul.f32 0.5, %v431_v40 }
 0x22f   : > { %v440_v44 = vmul.f32 0.70710677, %v426_v42  ;;  %v436_v57 = vmul.f32 0.5, %v426_v42 }
 0x230   : > { %711 = verf.f32 %v441_v43 }
 0x231   : > { %713 = verf.f32 %v440_v44 }
 0x236   : > { %v708_v45 = vpop.eup %707 }
 0x237   : > { %v710_v46 = vpop.eup %709  ;;  %v447_v48 = vadd.f32 1.0, %v708_v45 }
 0x238   : > { %v446_v50 = vadd.f32 1.0, %v710_v46 }
 0x239   : > { %v451_v51 = vmul.f32 %v447_v48, %v435_v47 }
 0x23a   : > { %v712_v52 = vpop.eup %711  ;;  %v450_v53 = vmul.f32 %v446_v50, %v434_v49 }
 0x23b   : > { %v714_v54 = vpop.eup %713  ;;  %v449_v56 = vadd.f32 1.0, %v712_v52 }
 0x23c   : > { %v448_v58 = vadd.f32 1.0, %v714_v54  ;;  %v655_v59 = vpack.c.bf16 %v451_v51, %v450_v53 }
 0x23d   : > { %v453_v60 = vmul.f32 %v449_v56, %v437_v55 }
 0x23e   : > { %v452_v61 = vmul.f32 %v448_v58, %v436_v57  ;;  %656 = vmatpush3.bf16.msra.mxu1 %v655_v59 }
 0x23f   : > { %657 = vmatprep.subr.bf16.mxu1 %v780_v27 }
 0x240   : > { %v658_v62 = vpack.c.bf16 %v453_v60, %v452_v61 }
 0x242   : > { %659 = vmatpush3.bf16.msra.mxu1 %v658_v62 }
 0x245   : > { %652 = vmatmul.mubr.msk.f32.vlgmr.msra.gmra.mrb[0].mxu1 %vm459_vm3, %v283_v63 }
 0x318   : > { %v529_v2 = vpop.f32.mrb[0].mxu1 }
 0x319   : > { %v530_v3 = vadd.f32 %v529_v2, %v457_v1  ;;  %v653_v4 = vpop.f32.mrb[1].mxu1 }
 0x31b   : > { %v533_v5 = vadd.f32 %v530_v3, %v877_v0 }
 0x31d   : > { %534 = vst [vmem:[%s269_s17] sm:$0xff] %v533_v5 }
 0x31e   : > { %728 = shalt.err (!%p725_p3)
}
 0x31f   : > { %s729_s9 = scalar_lea.hbm %s927_s21, 128  ;;  %s733_s15 = scalar_lea.hbm %s976_s7, 256 }
 0x320   : > { %p730_p4 = scmp.ne.s32.totalorder %s927_s21, %s729_s9  ;;  %p734_p9 = scmp.lt.u32.totalorder %s927_s21, %s976_s7 }
 0x321   : > { %p735_p10 = scmp.lt.u32.totalorder %s733_s15, %s729_s9  ;;  %p737_p12 = scmp.lt.u32.totalorder %s729_s9, %s927_s21 }
 0x322   : > { %p731_p7 = pnand %p730_p4, %p862_p5 }
 0x323   : > { %p736_p11 = por %p735_p10, %p734_p9 }
 0x324   : > { %p732_p8 = pneg %p731_p7 }
 0x325   : > { %p738_p13 = por %p737_p12, %p736_p11 }
 0x327   : > { %p739_p0 = pnand %p738_p13, %p732_p8 }
 0x329   : > { %742 = shalt.err (!%p739_p0)
}
 0x32a   : > { %660 = dma.vmem_to_hbm [thread:$0]  (%p862_p5), %s929_s18, 128, %s927_s21, %s536_s22  }
 0x32b PF: > { %p666_p1 = scmp.ge.s32.totalorder %s777_s27, 2  ;;  %s561_s19 = sand.u32 1, %s765_s24  }
 0x32c   : > { %s562_s20 = scalar_lea.sflag [#allocation3], %s561_s19 }
 0x32d   : > { %p663_p2 = pnand %p666_p1, %p866_p6 }
 0x32f   : > { %760 = dma.done.wait (!%p663_p2), %s562_s20, 128  }
 0x330   : > { %762 = vsyncadd (!%p663_p2), %s562_s20, 4294967168  ;;  %p17_p3 = scmp.ge.s32.totalorder %s849_s30, 4   ;;  %s979_s24 = smov %s769_s25 }
 0x331   : > { %s980_s25 = smov %s773_s26  ;;  %s981_s26 = smov %s860_s10 }
 0x332   : > { %s982_s27 = smov %s849_s30  ;;  %19 = sbr.rel (!%p17_p3) target bundleno = 3 (0x3), region = 83 }
 0x339   :  { %567 = vsyncpa [#allocation3], 1 }
 0x33a   :  { %569 = vsyncpa [#allocation3 + $0x1], 1 }

</bundles_post_ra>
